<compile_context>
chip_gen: v5e
topology: v5e:2x2
jax: 0.10.0
libtpu: 0.0.40
codegen_flags: <defaults>
</compile_context>

<pallas_src>
import functools
import math

import numpy as np
import jax
import jax.numpy as jnp
from jax.experimental import pallas as pl
from jax.experimental.pallas import tpu as pltpu


def _basic_block_kernel(x_ref, w1_ref, b1_ref, w2_ref, b2_ref, o_ref, mid,
                        *, M, Hp, H, WCp):
    """Fused conv3x3+BN+ReLU -> conv3x3+BN -> +residual -> ReLU.

    x_ref : (M, WCp) bf16   TN images stacked along rows, each H-halo padded
                            (Hp = H+2 rows per image), lane axis = W*Cp.
    w*_ref: (3, WCp, WCp) bf16  banded weights (kw taps + BN scale folded in).
    b*_ref: (1, WCp) f32    folded BN bias tiled over W.
    o_ref : (M, WCp) f32    output in the same padded frame (pad rows unused).
    mid   : VMEM((M, WCp), bf16) scratch for the halo-framed conv1 output.
    """

    def conv3x3(src_ref, w_ref, b_ref):
        # Three MXU matmuls with K = N = W*Cp; kw taps live inside the banded
        # weight, kh taps are the three row-shifted views of the halo frame.
        acc = jnp.dot(src_ref[0:M - 2, :], w_ref[0],
                      preferred_element_type=jnp.float32)
        acc = acc + jnp.dot(src_ref[1:M - 1, :], w_ref[1],
                            preferred_element_type=jnp.float32)
        acc = acc + jnp.dot(src_ref[2:M, :], w_ref[2],
                            preferred_element_type=jnp.float32)
        return acc + b_ref[...]                      # f32 epilogue

    # ---- conv1 + bn1 + relu (intermediate never leaves VMEM) ----
    out1 = jnp.maximum(conv3x3(x_ref, w1_ref, b1_ref), 0.0)      # (M-2, WCp) f32

    # Stage into the halo frame: row q of out1 -> padded-frame row q+1. Zero
    # the per-image H-pad rows (hp == 0 or hp == H+1) so `mid` carries SAME
    # zero padding for conv2; this also kills the cross-image garbage rows.
    r = jax.lax.broadcasted_iota(jnp.int32, (M - 2, WCp), 0) + 1   # frame row
    hp = r % Hp
    interior = jnp.logical_and(hp >= 1, hp <= H)
    mid[1:M - 1, :] = jnp.where(interior, out1, 0.0).astype(jnp.bfloat16)
    zrow_b = jnp.zeros((1, WCp), jnp.bfloat16)
    mid[0:1, :] = zrow_b
    mid[M - 1:M, :] = zrow_b

    # ---- conv2 + bn2 + identity shortcut + relu ----
    out2 = conv3x3(mid, w2_ref, b2_ref)                            # (M-2, WCp) f32
    res = x_ref[1:M - 1, :].astype(jnp.float32)     # re-read at point of use
    o_ref[1:M - 1, :] = jnp.maximum(out2 + res, 0.0)
    zrow_f = jnp.zeros((1, WCp), jnp.float32)
    o_ref[0:1, :] = zrow_f
    o_ref[M - 1:M, :] = zrow_f


def _fold_bn_into_weights(w, scale):
    """w: (Cout, Cin, 3, 3) PyTorch layout; scale: (Cout,) -> (kh, kw, Cin, Cout)."""
    wt = jnp.transpose(w, (2, 3, 1, 0)).astype(jnp.float32)
    return wt * scale.astype(jnp.float32)[None, None, None, :]


def _band_weights(wt, W):
    """wt: (3, 3, Cin, Cout) -> (3, W*Cin, W*Cout) banded matrices (one per kh).

    Block (wi, wo) of band[kh] equals wt[kh, kw] when wi == wo + kw - 1 and is
    zero otherwise; out-of-range taps are absent, which implements the SAME
    zero padding along W.
    """
    Cin, Cout = wt.shape[2], wt.shape[3]
    bands = []
    for dh in range(3):
        acc = jnp.zeros((W, Cin, W, Cout), jnp.float32)
        for dw in range(3):
            diag = jnp.asarray(np.eye(W, k=1 - dw, dtype=np.float32))
            acc = acc + jnp.einsum('io,cd->icod', diag, wt[dh, dw])
        bands.append(acc.reshape(W * Cin, W * Cout))
    return jnp.stack(bands, axis=0)


def _pick_batch_tile(N, Hp, target_rows=256):
    """Largest divisor of N whose stacked row count TN*Hp stays near target."""
    want = max(1, min(N, max(1, target_rows // Hp)))
    for t in range(want, 0, -1):
        if N % t == 0:
            return t
    return 1


def basic_block_forward(x_nchw, w1, w2, scale1, bias1, scale2, bias2):
    """x_nchw: (N, C, H, W) float32.  w*: (Cout, Cin, 3, 3) PyTorch layout."""
    N, C, H, W = x_nchw.shape
    Hp = H + 2

    # Zero-pad channels so the lane (last) dim W*Cp is a multiple of 128.
    step = 128 // math.gcd(W, 128)
    Cp = ((C + step - 1) // step) * step
    WCp = W * Cp

    TN = _pick_batch_tile(N, Hp)            # images stacked per grid step
    G = N // TN
    M = TN * Hp                             # matmul M per grid step

    # NCHW -> NHWC, H-halo zero rows + channel zero pad, flatten W*Cp, bf16,
    # then group TN images along the row axis of each grid block.
    x = jnp.transpose(x_nchw, (0, 2, 3, 1)).astype(jnp.float32)
    x = jnp.pad(x, ((0, 0), (1, 1), (0, 0), (0, Cp - C)))
    x = x.reshape(N, Hp, WCp).astype(jnp.bfloat16).reshape(G, M, WCp)

    def padw(w):
        return jnp.pad(w.astype(jnp.float32),
                       ((0, Cp - C), (0, Cp - C), (0, 0), (0, 0)))

    def padv(v):
        return jnp.pad(v.astype(jnp.float32), (0, Cp - C))

    # Fold BN scale into the conv weights (f32), band over W, then cast bf16.
    w1b = _band_weights(_fold_bn_into_weights(padw(w1), padv(scale1)), W
                        ).astype(jnp.bfloat16)                 # (3, WCp, WCp)
    w2b = _band_weights(_fold_bn_into_weights(padw(w2), padv(scale2)), W
                        ).astype(jnp.bfloat16)
    b1t = jnp.tile(padv(bias1), W).reshape(1, WCp)             # f32
    b2t = jnp.tile(padv(bias2), W).reshape(1, WCp)

    out = pl.pallas_call(
        functools.partial(_basic_block_kernel, M=M, Hp=Hp, H=H, WCp=WCp),
        out_shape=jax.ShapeDtypeStruct((G, M, WCp), jnp.float32),
        grid=(G,),
        in_specs=[
            pl.BlockSpec((None, M, WCp), lambda g: (g, 0, 0)),
            pl.BlockSpec((3, WCp, WCp), lambda g: (0, 0, 0)),
            pl.BlockSpec((1, WCp), lambda g: (0, 0)),
            pl.BlockSpec((3, WCp, WCp), lambda g: (0, 0, 0)),
            pl.BlockSpec((1, WCp), lambda g: (0, 0)),
        ],
        out_specs=pl.BlockSpec((None, M, WCp), lambda g: (g, 0, 0)),
        scratch_shapes=[pltpu.VMEM((M, WCp), jnp.bfloat16)],
        compiler_params=pltpu.CompilerParams(
            dimension_semantics=("parallel",)),
    )(x, w1b, b1t, w2b, b2t)

    # (G, M, WCp) -> (N, Hp, W, Cp) -> strip H halo + channel pad -> NCHW.
    out = out.reshape(N, Hp, W, Cp)[:, 1:H + 1, :, :C]
    return jnp.transpose(out, (0, 3, 1, 2))


def _reference_forward(x, w1, w2, s1, b1, s2, b2):
    """Pure-JAX f32 reference (NCHW, same math as the PyTorch module in eval)."""
    def conv(a, w):
        return jax.lax.conv_general_dilated(
            a, w, window_strides=(1, 1), padding="SAME",
            dimension_numbers=("NCHW", "OIHW", "NCHW"))
    bcast = lambda v: v[None, :, None, None]
    out = jnp.maximum(conv(x, w1) * bcast(s1) + bcast(b1), 0.0)
    out = conv(out, w2) * bcast(s2) + bcast(b2)
    return jnp.maximum(out + x, 0.0)


if __name__ == "__main__":
    key = jax.random.PRNGKey(0)
    k = jax.random.split(key, 12)

    N, C, H, W = 2, 4, 16, 16          # in_planes = planes = 4, stride = 1
    eps = 1e-5

    x = jax.random.normal(k[0], (N, C, H, W), jnp.float32)

    # conv weights, PyTorch layout (Cout, Cin, 3, 3)
    w1 = jax.random.normal(k[1], (C, C, 3, 3), jnp.float32) * 0.2
    w2 = jax.random.normal(k[2], (C, C, 3, 3), jnp.float32) * 0.2

    # BatchNorm params (eval mode): gamma, beta, running_mean, running_var
    g1 = 1.0 + 0.1 * jax.random.normal(k[3], (C,), jnp.float32)
    be1 = 0.1 * jax.random.normal(k[4], (C,), jnp.float32)
    m1 = 0.1 * jax.random.normal(k[5], (C,), jnp.float32)
    v1 = 0.5 + jax.random.uniform(k[6], (C,), jnp.float32)
    g2 = 1.0 + 0.1 * jax.random.normal(k[7], (C,), jnp.float32)
    be2 = 0.1 * jax.random.normal(k[8], (C,), jnp.float32)
    m2 = 0.1 * jax.random.normal(k[9], (C,), jnp.float32)
    v2 = 0.5 + jax.random.uniform(k[10], (C,), jnp.float32)

    # Fold BN into per-channel scale / bias (kept f32 before any bf16 cast).
    scale1 = g1 / jnp.sqrt(v1 + eps)
    bias1 = be1 - m1 * scale1
    scale2 = g2 / jnp.sqrt(v2 + eps)
    bias2 = be2 - m2 * scale2

    out = basic_block_forward(x, w1, w2, scale1, bias1, scale2, bias2)
    out = jax.block_until_ready(out)

    ref = _reference_forward(x, w1, w2, scale1, bias1, scale2, bias2)
    assert out.shape == (N, C, H, W)
    # bf16 MXU operands vs f32 reference -> loosened tolerance (per review).
    max_err = jnp.max(jnp.abs(out - ref))
    mean_err = jnp.mean(jnp.abs(out - ref))
    assert max_err < 2e-1, f"max err vs JAX reference: {max_err}"
    assert mean_err < 2e-2, f"mean err vs JAX reference: {mean_err}"

    print("KERNEL_OK")
</pallas_src>

<mosaic_0001>
module attributes {stable_mosaic.version = 11 : i64} {
  func.func @_basic_block_kernel(%arg0: i32, %arg1: memref<1x36x128xbf16, #tpu.memory_space<vmem>>, %arg2: memref<3x128x128xbf16, #tpu.memory_space<vmem>>, %arg3: memref<1x128xf32, #tpu.memory_space<vmem>>, %arg4: memref<3x128x128xbf16, #tpu.memory_space<vmem>>, %arg5: memref<1x128xf32, #tpu.memory_space<vmem>>, %arg6: memref<1x36x128xf32, #tpu.memory_space<vmem>>, %arg7: memref<36x128xbf16, #tpu.memory_space<vmem>>) attributes {dimension_semantics = [#tpu.dimension_semantics<parallel>], iteration_bounds = array<i64: 1>, scalar_prefetch = 0 : i64, scratch_operands = 1 : i64, tpu.core_type = #tpu.core_type<tc>, window_params = [{transform_indices = @transform_0, window_bounds = array<i64: 1, 36, 128>}, {pipeline_mode = #tpu.pipeline_mode<synchronous>, transform_indices = @transform_1, window_bounds = array<i64: 3, 128, 128>}, {pipeline_mode = #tpu.pipeline_mode<synchronous>, transform_indices = @transform_2, window_bounds = array<i64: 1, 128>}, {pipeline_mode = #tpu.pipeline_mode<synchronous>, transform_indices = @transform_3, window_bounds = array<i64: 3, 128, 128>}, {pipeline_mode = #tpu.pipeline_mode<synchronous>, transform_indices = @transform_4, window_bounds = array<i64: 1, 128>}, {transform_indices = @transform_5, window_bounds = array<i64: 1, 36, 128>}]} {
    %c0 = arith.constant 0 : index
    %c0_0 = arith.constant 0 : index
    %c0_1 = arith.constant 0 : index
    %0 = vector.load %arg1[%c0, %c0_0, %c0_1] : memref<1x36x128xbf16, #tpu.memory_space<vmem>>, vector<1x34x128xbf16>
    %1 = vector.shape_cast %0 : vector<1x34x128xbf16> to vector<34x128xbf16>
    %c0_2 = arith.constant 0 : index
    %c0_3 = arith.constant 0 : index
    %c0_4 = arith.constant 0 : index
    %2 = vector.load %arg2[%c0_2, %c0_3, %c0_4] : memref<3x128x128xbf16, #tpu.memory_space<vmem>>, vector<1x128x128xbf16>
    %3 = vector.shape_cast %2 : vector<1x128x128xbf16> to vector<128x128xbf16>
    %cst = arith.constant dense<0.000000e+00> : vector<34x128xf32>
    %4 = tpu.matmul %1, %3, %cst {dimension_numbers = #tpu.dot_dimension_numbers<[1], [0], [0], [1], [0, 0, 1, 1], [], []>} : vector<34x128xbf16>, vector<128x128xbf16>, vector<34x128xf32> -> vector<34x128xf32>
    %c0_5 = arith.constant 0 : index
    %c1 = arith.constant 1 : index
    %c0_6 = arith.constant 0 : index
    %5 = vector.load %arg1[%c0_5, %c1, %c0_6] : memref<1x36x128xbf16, #tpu.memory_space<vmem>>, vector<1x34x128xbf16>
    %6 = vector.shape_cast %5 : vector<1x34x128xbf16> to vector<34x128xbf16>
    %c1_7 = arith.constant 1 : index
    %c0_8 = arith.constant 0 : index
    %c0_9 = arith.constant 0 : index
    %7 = vector.load %arg2[%c1_7, %c0_8, %c0_9] : memref<3x128x128xbf16, #tpu.memory_space<vmem>>, vector<1x128x128xbf16>
    %8 = vector.shape_cast %7 : vector<1x128x128xbf16> to vector<128x128xbf16>
    %cst_10 = arith.constant dense<0.000000e+00> : vector<34x128xf32>
    %9 = tpu.matmul %6, %8, %cst_10 {dimension_numbers = #tpu.dot_dimension_numbers<[1], [0], [0], [1], [0, 0, 1, 1], [], []>} : vector<34x128xbf16>, vector<128x128xbf16>, vector<34x128xf32> -> vector<34x128xf32>
    %10 = arith.addf %4, %9 : vector<34x128xf32>
    %c0_11 = arith.constant 0 : index
    %c2 = arith.constant 2 : index
    %c0_12 = arith.constant 0 : index
    %11 = vector.load %arg1[%c0_11, %c2, %c0_12] : memref<1x36x128xbf16, #tpu.memory_space<vmem>>, vector<1x34x128xbf16>
    %12 = vector.shape_cast %11 : vector<1x34x128xbf16> to vector<34x128xbf16>
    %c2_13 = arith.constant 2 : index
    %c0_14 = arith.constant 0 : index
    %c0_15 = arith.constant 0 : index
    %13 = vector.load %arg2[%c2_13, %c0_14, %c0_15] : memref<3x128x128xbf16, #tpu.memory_space<vmem>>, vector<1x128x128xbf16>
    %14 = vector.shape_cast %13 : vector<1x128x128xbf16> to vector<128x128xbf16>
    %cst_16 = arith.constant dense<0.000000e+00> : vector<34x128xf32>
    %15 = tpu.matmul %12, %14, %cst_16 {dimension_numbers = #tpu.dot_dimension_numbers<[1], [0], [0], [1], [0, 0, 1, 1], [], []>} : vector<34x128xbf16>, vector<128x128xbf16>, vector<34x128xf32> -> vector<34x128xf32>
    %16 = arith.addf %10, %15 : vector<34x128xf32>
    %c0_17 = arith.constant 0 : index
    %c0_18 = arith.constant 0 : index
    %17 = vector.load %arg3[%c0_17, %c0_18] : memref<1x128xf32, #tpu.memory_space<vmem>>, vector<1x128xf32>
    %18 = vector.broadcast %17 : vector<1x128xf32> to vector<34x128xf32>
    %19 = arith.addf %16, %18 : vector<34x128xf32>
    %cst_19 = arith.constant 0.000000e+00 : f32
    %20 = vector.broadcast %cst_19 : f32 to vector<34x128xf32>
    %21 = arith.maximumf %19, %20 : vector<34x128xf32>
    %22 = tpu.iota {dimensions = array<i32: 0>} : vector<34x128xi32>
    %c1_i32 = arith.constant 1 : i32
    %23 = vector.broadcast %c1_i32 : i32 to vector<34x128xi32>
    %24 = arith.addi %22, %23 : vector<34x128xi32>
    %c18_i32 = arith.constant 18 : i32
    %c0_i32 = arith.constant 0 : i32
    %25 = arith.cmpi eq, %c18_i32, %c0_i32 : i32
    %c1_i32_20 = arith.constant 1 : i32
    %26 = arith.select %25, %c1_i32_20, %c18_i32 : i32
    %27 = vector.broadcast %26 : i32 to vector<34x128xi32>
    %28 = arith.remsi %24, %27 : vector<34x128xi32>
    %c0_i32_21 = arith.constant 0 : i32
    %29 = vector.broadcast %c0_i32_21 : i32 to vector<34x128xi32>
    %30 = arith.cmpi ne, %28, %29 : vector<34x128xi32>
    %c0_i32_22 = arith.constant 0 : i32
    %31 = vector.broadcast %c0_i32_22 : i32 to vector<34x128xi32>
    %32 = arith.cmpi slt, %28, %31 : vector<34x128xi32>
    %c0_i32_23 = arith.constant 0 : i32
    %33 = arith.cmpi slt, %26, %c0_i32_23 : i32
    %34 = vector.broadcast %33 : i1 to vector<34x128xi1>
    %35 = vector.broadcast %34 : vector<34x128xi1> to vector<34x128xi1>
    %36 = arith.xori %32, %35 : vector<34x128xi1>
    %37 = arith.andi %36, %30 : vector<34x128xi1>
    %38 = vector.broadcast %26 : i32 to vector<34x128xi32>
    %39 = arith.addi %28, %38 : vector<34x128xi32>
    %40 = arith.select %37, %39, %28 : vector<34x128xi1>, vector<34x128xi32>
    %c1_i32_24 = arith.constant 1 : i32
    %41 = vector.broadcast %c1_i32_24 : i32 to vector<34x128xi32>
    %42 = arith.cmpi sge, %40, %41 : vector<34x128xi32>
    %c16_i32 = arith.constant 16 : i32
    %43 = vector.broadcast %c16_i32 : i32 to vector<34x128xi32>
    %44 = arith.cmpi sle, %40, %43 : vector<34x128xi32>
    %45 = arith.andi %42, %44 : vector<34x128xi1>
    %cst_25 = arith.constant 0.000000e+00 : f32
    %46 = vector.broadcast %cst_25 : f32 to vector<34x128xf32>
    %47 = arith.select %45, %21, %46 : vector<34x128xi1>, vector<34x128xf32>
    %48 = arith.truncf %47 : vector<34x128xf32> to vector<34x128xbf16>
    %c1_26 = arith.constant 1 : index
    %c0_27 = arith.constant 0 : index
    %49 = vector.load %arg7[%c1_26, %c0_27] : memref<36x128xbf16, #tpu.memory_space<vmem>>, vector<34x128xbf16>
    tpu.vector_store %arg7[%c1_26, %c0_27], %48 {strides = array<i32>} : memref<36x128xbf16, #tpu.memory_space<vmem>>, vector<34x128xbf16>,
    %cst_28 = arith.constant 0.000000e+00 : bf16
    %50 = vector.broadcast %cst_28 : bf16 to vector<1x128xbf16>
    %c0_29 = arith.constant 0 : index
    %c0_30 = arith.constant 0 : index
    %51 = vector.load %arg7[%c0_29, %c0_30] : memref<36x128xbf16, #tpu.memory_space<vmem>>, vector<1x128xbf16>
    tpu.vector_store %arg7[%c0_29, %c0_30], %50 {strides = array<i32>} : memref<36x128xbf16, #tpu.memory_space<vmem>>, vector<1x128xbf16>,
    %c35 = arith.constant 35 : index
    %c0_31 = arith.constant 0 : index
    %52 = vector.load %arg7[%c35, %c0_31] : memref<36x128xbf16, #tpu.memory_space<vmem>>, vector<1x128xbf16>
    tpu.vector_store %arg7[%c35, %c0_31], %50 {strides = array<i32>} : memref<36x128xbf16, #tpu.memory_space<vmem>>, vector<1x128xbf16>,
    %c0_32 = arith.constant 0 : index
    %c0_33 = arith.constant 0 : index
    %53 = vector.load %arg7[%c0_32, %c0_33] : memref<36x128xbf16, #tpu.memory_space<vmem>>, vector<34x128xbf16>
    %c0_34 = arith.constant 0 : index
    %c0_35 = arith.constant 0 : index
    %c0_36 = arith.constant 0 : index
    %54 = vector.load %arg4[%c0_34, %c0_35, %c0_36] : memref<3x128x128xbf16, #tpu.memory_space<vmem>>, vector<1x128x128xbf16>
    %55 = vector.shape_cast %54 : vector<1x128x128xbf16> to vector<128x128xbf16>
    %cst_37 = arith.constant dense<0.000000e+00> : vector<34x128xf32>
    %56 = tpu.matmul %53, %55, %cst_37 {dimension_numbers = #tpu.dot_dimension_numbers<[1], [0], [0], [1], [0, 0, 1, 1], [], []>} : vector<34x128xbf16>, vector<128x128xbf16>, vector<34x128xf32> -> vector<34x128xf32>
    %c1_38 = arith.constant 1 : index
    %c0_39 = arith.constant 0 : index
    %57 = vector.load %arg7[%c1_38, %c0_39] : memref<36x128xbf16, #tpu.memory_space<vmem>>, vector<34x128xbf16>
    %c1_40 = arith.constant 1 : index
    %c0_41 = arith.constant 0 : index
    %c0_42 = arith.constant 0 : index
    %58 = vector.load %arg4[%c1_40, %c0_41, %c0_42] : memref<3x128x128xbf16, #tpu.memory_space<vmem>>, vector<1x128x128xbf16>
    %59 = vector.shape_cast %58 : vector<1x128x128xbf16> to vector<128x128xbf16>
    %cst_43 = arith.constant dense<0.000000e+00> : vector<34x128xf32>
    %60 = tpu.matmul %57, %59, %cst_43 {dimension_numbers = #tpu.dot_dimension_numbers<[1], [0], [0], [1], [0, 0, 1, 1], [], []>} : vector<34x128xbf16>, vector<128x128xbf16>, vector<34x128xf32> -> vector<34x128xf32>
    %61 = arith.addf %56, %60 : vector<34x128xf32>
    %c2_44 = arith.constant 2 : index
    %c0_45 = arith.constant 0 : index
    %62 = vector.load %arg7[%c2_44, %c0_45] : memref<36x128xbf16, #tpu.memory_space<vmem>>, vector<34x128xbf16>
    %c2_46 = arith.constant 2 : index
    %c0_47 = arith.constant 0 : index
    %c0_48 = arith.constant 0 : index
    %63 = vector.load %arg4[%c2_46, %c0_47, %c0_48] : memref<3x128x128xbf16, #tpu.memory_space<vmem>>, vector<1x128x128xbf16>
    %64 = vector.shape_cast %63 : vector<1x128x128xbf16> to vector<128x128xbf16>
    %cst_49 = arith.constant dense<0.000000e+00> : vector<34x128xf32>
    %65 = tpu.matmul %62, %64, %cst_49 {dimension_numbers = #tpu.dot_dimension_numbers<[1], [0], [0], [1], [0, 0, 1, 1], [], []>} : vector<34x128xbf16>, vector<128x128xbf16>, vector<34x128xf32> -> vector<34x128xf32>
    %66 = arith.addf %61, %65 : vector<34x128xf32>
    %c0_50 = arith.constant 0 : index
    %c0_51 = arith.constant 0 : index
    %67 = vector.load %arg5[%c0_50, %c0_51] : memref<1x128xf32, #tpu.memory_space<vmem>>, vector<1x128xf32>
    %68 = vector.broadcast %67 : vector<1x128xf32> to vector<34x128xf32>
    %69 = arith.addf %66, %68 : vector<34x128xf32>
    %c0_52 = arith.constant 0 : index
    %c1_53 = arith.constant 1 : index
    %c0_54 = arith.constant 0 : index
    %70 = vector.load %arg1[%c0_52, %c1_53, %c0_54] : memref<1x36x128xbf16, #tpu.memory_space<vmem>>, vector<1x34x128xbf16>
    %71 = vector.shape_cast %70 : vector<1x34x128xbf16> to vector<34x128xbf16>
    %72 = arith.extf %71 : vector<34x128xbf16> to vector<34x128xf32>
    %73 = arith.addf %69, %72 : vector<34x128xf32>
    %cst_55 = arith.constant 0.000000e+00 : f32
    %74 = vector.broadcast %cst_55 : f32 to vector<34x128xf32>
    %75 = arith.maximumf %73, %74 : vector<34x128xf32>
    %c0_56 = arith.constant 0 : index
    %c1_57 = arith.constant 1 : index
    %c0_58 = arith.constant 0 : index
    %76 = vector.load %arg6[%c0_56, %c1_57, %c0_58] : memref<1x36x128xf32, #tpu.memory_space<vmem>>, vector<1x34x128xf32>
    %77 = vector.shape_cast %76 : vector<1x34x128xf32> to vector<34x128xf32>
    %78 = vector.shape_cast %75 : vector<34x128xf32> to vector<1x34x128xf32>
    tpu.vector_store %arg6[%c0_56, %c1_57, %c0_58], %78 {strides = array<i32>} : memref<1x36x128xf32, #tpu.memory_space<vmem>>, vector<1x34x128xf32>,
    %cst_59 = arith.constant 0.000000e+00 : f32
    %79 = vector.broadcast %cst_59 : f32 to vector<1x128xf32>
    %c0_60 = arith.constant 0 : index
    %c0_61 = arith.constant 0 : index
    %c0_62 = arith.constant 0 : index
    %80 = vector.load %arg6[%c0_60, %c0_61, %c0_62] : memref<1x36x128xf32, #tpu.memory_space<vmem>>, vector<1x1x128xf32>
    %81 = vector.shape_cast %80 : vector<1x1x128xf32> to vector<1x128xf32>
    %82 = vector.shape_cast %79 : vector<1x128xf32> to vector<1x1x128xf32>
    tpu.vector_store %arg6[%c0_60, %c0_61, %c0_62], %82 {strides = array<i32>} : memref<1x36x128xf32, #tpu.memory_space<vmem>>, vector<1x1x128xf32>,
    %c0_63 = arith.constant 0 : index
    %c35_64 = arith.constant 35 : index
    %c0_65 = arith.constant 0 : index
    %83 = vector.load %arg6[%c0_63, %c35_64, %c0_65] : memref<1x36x128xf32, #tpu.memory_space<vmem>>, vector<1x1x128xf32>
    %84 = vector.shape_cast %83 : vector<1x1x128xf32> to vector<1x128xf32>
    %85 = vector.shape_cast %79 : vector<1x128xf32> to vector<1x1x128xf32>
    tpu.vector_store %arg6[%c0_63, %c35_64, %c0_65], %85 {strides = array<i32>} : memref<1x36x128xf32, #tpu.memory_space<vmem>>, vector<1x1x128xf32>,
    return
  }
  func.func @transform_0(%arg0: i32) -> (i32, i32, i32) {
    %c0_i32 = arith.constant 0 : i32
    %c0_i32_0 = arith.constant 0 : i32
    %c0_i32_1 = arith.constant 0 : i32
    return %arg0, %c0_i32, %c0_i32_0 : i32, i32, i32
  }
  func.func @transform_1(%arg0: i32) -> (i32, i32, i32) {
    %c0_i32 = arith.constant 0 : i32
    %c0_i32_0 = arith.constant 0 : i32
    %c0_i32_1 = arith.constant 0 : i32
    %c0_i32_2 = arith.constant 0 : i32
    return %c0_i32, %c0_i32_0, %c0_i32_1 : i32, i32, i32
  }
  func.func @transform_2(%arg0: i32) -> (i32, i32) {
    %c0_i32 = arith.constant 0 : i32
    %c0_i32_0 = arith.constant 0 : i32
    %c0_i32_1 = arith.constant 0 : i32
    return %c0_i32, %c0_i32_0 : i32, i32
  }
  func.func @transform_3(%arg0: i32) -> (i32, i32, i32) {
    %c0_i32 = arith.constant 0 : i32
    %c0_i32_0 = arith.constant 0 : i32
    %c0_i32_1 = arith.constant 0 : i32
    %c0_i32_2 = arith.constant 0 : i32
    return %c0_i32, %c0_i32_0, %c0_i32_1 : i32, i32, i32
  }
  func.func @transform_4(%arg0: i32) -> (i32, i32) {
    %c0_i32 = arith.constant 0 : i32
    %c0_i32_0 = arith.constant 0 : i32
    %c0_i32_1 = arith.constant 0 : i32
    return %c0_i32, %c0_i32_0 : i32, i32
  }
  func.func @transform_5(%arg0: i32) -> (i32, i32, i32) {
    %c0_i32 = arith.constant 0 : i32
    %c0_i32_0 = arith.constant 0 : i32
    %c0_i32_1 = arith.constant 0 : i32
    return %arg0, %c0_i32, %c0_i32_0 : i32, i32, i32
  }
}

</mosaic_0001>

<bundles_post_ra>
// kernel: tpu_custom_call.1
= control target key start
LH: loop header
LB: loop body
LE: loop exit
PB: predicated region body
PF: predicated region fallthrough
CT: control target
= control target key end

     0   :  { %10 = vsyncpa [#allocation4], 0  ;;  %s1667_s0 = inlined_call_operand.hbm [shape: bf16[1,36,128], index: 0, kind: input, shape index: {}]   ;;  %s1668_s1 = inlined_call_operand.hbm [shape: bf16[3,128,128], index: 1, kind: input, shape index: {}]   ;;  %s1669_s2 = inlined_call_operand.vmem [shape: f32[1,128], index: 2, kind: input, shape index: {}]   ;;  %s1670_s3 = inlined_call_operand.hbm [shape: bf16[3,128,128], index: 3, kind: input, shape index: {}]   ;;  %s1671_s4 = inlined_call_operand.vmem [shape: f32[1,128], index: 4, kind: input, shape index: {}]   ;;  %s1672_s5 = inlined_call_operand.vmem [shape: f32[1,36,128], index: 5, kind: output, shape index: {}]  }
   0x1   :  { %11 = vsyncpa [#allocation6], 0  ;;  %s29_s20 = sshll.u32 %s1668_s1, 4  ;;  %s1465_s21 = smov [#allocation5]   ;;  %s30_s20 = int_to_ptr.hbm [resolvable:$true] %s29_s20 }
   0x2   :  { %s31_s22 = sshll.u32 %s1465_s21, 4  ;;  %s16_s25 = sshll.u32 %s1667_s0, 4  ;;  %s32_s22 = int_to_ptr.vmem [resolvable:$true] %s31_s22  ;;  %s17_s25 = int_to_ptr.hbm [resolvable:$true] %s16_s25 }
   0x3   :  { %s1466_s26 = smov 64   ;;  %s1467_s27 = smov 4  }
   0x4   :  { %37 = dma.hbm_to_vmem [thread:$0]  %s30_s20, 3072, %s32_s22, [#allocation6], %s1466_s26, %s1466_s26, %s1467_s27  }
   0x5   :  { %s1468_s28 = smov [#allocation3]   ;;  %s44_s7 = sshll.u32 %s1670_s3, 4  ;;  %s45_s7 = int_to_ptr.hbm [resolvable:$true] %s44_s7 }
   0x6   :  { %s18_s29 = sshll.u32 %s1468_s28, 4  ;;  %s1469_s1 = smov [#allocation7]   ;;  %s19_s29 = int_to_ptr.vmem [resolvable:$true] %s18_s29 }
   0x7   :  { %24 = dma.hbm_to_vmem [thread:$0]  %s17_s25, 320, %s19_s29, [#allocation4], %s1466_s26, %s1466_s26, %s1467_s27  }
   0x8   :  { %s46_s8 = sshll.u32 %s1469_s1, 4  ;;  %s47_s8 = int_to_ptr.vmem [resolvable:$true] %s46_s8 }
   0x9   :  { %52 = dma.hbm_to_vmem [thread:$0]  %s45_s7, 3072, %s47_s8, [#allocation6], %s1466_s26, %s1466_s26, %s1467_s27  }
   0xa   :  { %1461 = dma.done.wait [#allocation4], 320  }
   0xb   :  { %1462 = vsyncadd [#allocation4], 4294966976 }
   0xc   :  { %1463 = dma.done.wait [#allocation6], 6144  }
   0xd   :  { %1464 = vsyncadd [#allocation6], 4294961152  ;;  %v1470_v0 = vmov 0.0   ;;  %v1307_v1 = vld [vmem:[#allocation5 + $0x78] sm:$0xff]  ;;  %v1306_v3 = vld [vmem:[#allocation5 + $0x70] sm:$0xff]  ;;  %vm316_vm1 = vcmask 1046528   ;;  %v415_v55 = vlaneseq }
   0xe   :  { %1083 = vst [vmem:[%s1672_s5] sm:$0x1] %v1470_v0  ;;  %v1299_v2 = vld [vmem:[#allocation5 + $0x38] sm:$0xff]  ;;  %1364 = vmatpush.bf16.msra.mxu2 %v1307_v1  ;;  %195 = vmatpush.bf16.msra.mxu0 %v1307_v1  ;;  %v1298_v4 = vld [vmem:[#allocation5 + $0x30] sm:$0xff]  ;;  %v1305_v5 = vld [vmem:[#allocation5 + $0x68] sm:$0xff]  ;;  %vm120_vm0 = vsmask.f32 7424 }
   0xf   :  { %1084 = vst [vmem:[%s1672_s5 + $0x23] sm:$0x1] %v1470_v0  ;;  %1372 = vmatpush.bf16.msra.mxu3 %v1299_v2  ;;  %272 = vmatpush.bf16.msra.mxu1 %v1299_v2  ;;  %v1297_v6 = vld [vmem:[#allocation5 + $0x28] sm:$0xff]  ;;  %v1304_v7 = vld [vmem:[#allocation5 + $0x60] sm:$0xff]  ;;  %v89_v8 = vld [vmem:[#allocation3 + $0x10] sm:$0x3] }
  0x10   :  { %v1296_v9 = vld [vmem:[#allocation5 + $0x20] sm:$0xff]  ;;  %v116_v10 = vunpack.c.l.b16 %v89_v8  ;;  %v1303_v11 = vld [vmem:[#allocation5 + $0x58] sm:$0xff]  ;;  %v1302_v14 = vld [vmem:[#allocation5 + $0x50] sm:$0xff]  ;;  %v416_v56 = vshrl.u32 %v415_v55, 7 }
  0x11   :  { %v1295_v12 = vld [vmem:[#allocation5 + $0x18] sm:$0xff]  ;;  %v1294_v15 = vld [vmem:[#allocation5 + $0x10] sm:$0xff]  ;;  %v1301_v17 = vld [vmem:[#allocation5 + $0x48] sm:$0xff] }
  0x12   :  { %1365 = vmatpush.bf16.msra.mxu2 %v1306_v3  ;;  %196 = vmatpush.bf16.msra.mxu0 %v1306_v3  ;;  %v1517_v13 = vpack.c.b16 %v116_v10, %v116_v10  ;;  %v1293_v18 = vld [vmem:[#allocation5 + $0x8] sm:$0xff]  ;;  %v72_v19 = vld [vmem:[#allocation3 + $0x10] sm:$0x1]  ;;  %v1291_v21 = vld [vmem:[#allocation3 + $0x8] sm:$0xff]  ;;  %v1531_v57 = vadd.s32 1, %v416_v56  ;;  %v417_v0 = vadd.s32 8, %v416_v56 }
  0x13   :  { %1373 = vmatpush.bf16.msra.mxu3 %v1298_v4  ;;  %273 = vmatpush.bf16.msra.mxu1 %v1298_v4  ;;  %v1520_v20 = vld [vmem:[#allocation3] sm:$0xff]   ;;  %v1300_v25 = vld [vmem:[#allocation5 + $0x40] sm:$0xff]  ;;  %v219_v26 = vunpack.c.l.b16 %v72_v19  ;;  %v129_v29 = vshll.u32 %v1291_v21, 16  ;;  %v1315_v30 = vld [vmem:[#allocation5 + $0xb8] sm:$0xff]  ;;  %v133_v39 = vshrl.u32 %v1291_v21, 16  ;;  %v318_v51 = vrot.slane %v1291_v21, 1 }
  0x14   :  { %v137_v16 = vshll.u32 %v1517_v13, 16  ;;  %v124_v22 = vshll.u32 %v1520_v20, 16  ;;  %v141_v24 = vshrl.u32 %v1517_v13, 16  ;;  %v122_v27 = vshrl.u32 %v1520_v20, 16  ;;  %v1292_v31 = vld [vmem:[#allocation5] sm:$0xff]  ;;  %v1314_v37 = vld [vmem:[#allocation5 + $0xb0] sm:$0xff] }
  0x15   :  { %v131_v33 = vrot.slane %v129_v29, 1  ;;  %v220_v35 = vpack.c.b16 %v219_v26, %v219_v26  ;;  %v1313_v38 = vld [vmem:[#allocation5 + $0xa8] sm:$0xff]  ;;  %v1312_v40 = vld [vmem:[#allocation5 + $0xa0] sm:$0xff]  ;;  %v1311_v42 = vld [vmem:[#allocation5 + $0x98] sm:$0xff]  ;;  %v320_v53 = vrot.slane %v1517_v13, 1  ;;  %v429_v58 = vand.u32 65535, %v1531_v57 }
  0x16   :  { %1366 = vmatpush.bf16.msra.mxu2 %v1305_v5  ;;  %197 = vmatpush.bf16.msra.mxu0 %v1305_v5  ;;  %v139_v23 = vrot.slane %v137_v16, 1  ;;  %v126_v28 = vrot.slane %v124_v22, 1  ;;  %v1310_v44 = vld [vmem:[#allocation5 + $0x90] sm:$0xff]  ;;  %v1358_v46 = vld [vmem:[#allocation3] sm:$0xe]  ;;  %v1308_v49 = vld [vmem:[#allocation5 + $0x80] sm:$0xff] }
  0x17   :  { %1374 = vmatpush.bf16.msra.mxu3 %v1297_v6  ;;  %274 = vmatpush.bf16.msra.mxu1 %v1297_v6  ;;  %v135_v41 = vor.u32 %v133_v39, %v131_v33  ;;  %v1357_v45 = vld [vmem:[#allocation3] sm:$0xf0]  ;;  %v1309_v47 = vld [vmem:[#allocation5 + $0x88] sm:$0xff]  ;;  %v321_v54 = vsel %vm316_vm1, %v318_v51, %v320_v53  ;;  %v430_v59 = vshrl.u32 %v1531_v57, 16  ;;  %v433_v60 = vmul.u32 58254, %v429_v58 }
  0x18   :  { %v127_v32 = vor.u32 %v126_v28, %v122_v27  ;;  %v143_v34 = vor.u32 %v141_v24, %v139_v23  ;;  %v1359_v48 = vor.u32 %v1358_v46, %v1357_v45  ;;  %v432_v61 = vmul.u32 14564, %v429_v58  ;;  %v1324_v28 = vld [vmem:[#allocation7 + $0x38] sm:$0xff]  ;;  %v1323_v39 = vld [vmem:[#allocation7 + $0x30] sm:$0xff] }
  0x19   :  { %v140_v43 = vsel %vm120_vm0, %v135_v41, %v139_v23  ;;  %v434_v62 = vmul.u32 14564, %v430_v59  ;;  %v436_v63 = vshll.u32 %v433_v60, 16  ;;  %v1535_v1 = vadd.s32 1, %v417_v0 }
  0x1a   :  { %1367 = vmatpush.bf16.msra.mxu2 %v1304_v7  ;;  %198 = vmatpush.bf16.msra.mxu0 %v1304_v7  ;;  %v132_v36 = vsel %vm120_vm0, %v127_v32, %v131_v33  ;;  %v317_v50 = vrot.slane %v1359_v48, 1  ;;  %v435_v5 = vmul.u32 58254, %v430_v59  ;;  %v1471_v7 = vmov 0  }
  0x1b   :  { %1375 = vmatpush.bf16.msra.mxu3 %v1296_v9  ;;  %275 = vmatpush.bf16.msra.mxu1 %v1296_v9  ;;  %v438_v2 = vshll.u32 %v434_v62, 16  ;;  %vm440_vm2 = vc.u32 %v432_v61, %v436_v63  ;;  %v442_v3 = vadd.s32 %v436_v63, %v432_v61  ;;  %v458_v4 = vand.u32 65535, %v1535_v1  ;;  %v1321_v63 = vld [vmem:[#allocation7 + $0x20] sm:$0xff] }
  0x1c   :  { %v319_v52 = vsel %vm316_vm1, %v317_v50, %v318_v51  ;;  %v459_v6 = vshrl.u32 %v1535_v1, 16  ;;  %v441_v8 = vsel %vm440_vm2, 1, %v1471_v7  ;;  %v418_v10 = vadd.s32 16, %v416_v56 }
  0x1d   :  { %v462_v9 = vmul.u32 58254, %v458_v4  ;;  %vm444_vm3 = vc.u32 %v442_v3, %v438_v2  ;;  %v439_v27 = vshrl.u32 %v434_v62, 16  ;;  %v419_v29 = vadd.s32 24, %v416_v56 }
  0x1e   :  { %1368 = vmatpush.bf16.msra.mxu2 %v1303_v11  ;;  %199 = vmatpush.bf16.msra.mxu0 %v1303_v11  ;;  %v461_v11 = vmul.u32 14564, %v458_v4  ;;  %v445_v16 = vsel %vm444_vm3, 1, %v1471_v7  ;;  %v420_v48 = vadd.s32 32, %v416_v56 }
  0x1f   :  { %1376 = vmatpush.bf16.msra.mxu3 %v1295_v12  ;;  %276 = vmatpush.bf16.msra.mxu1 %v1295_v12  ;;  %v1540_v12 = vmul.u32 14564, %v459_v6  ;;  %v465_v13 = vshll.u32 %v462_v9, 16 }
  0x21   :  { %vm469_vm4 = vc.u32 %v461_v11, %v465_v13  ;;  %v471_v19 = vadd.s32 %v465_v13, %v461_v11  ;;  %v468_v59 = vshrl.u32 %v1540_v12, 16 }
  0x22   :  { %1369 = vmatpush.bf16.msra.mxu2 %v1302_v14  ;;  %200 = vmatpush.bf16.msra.mxu0 %v1302_v14  ;;  %v443_v14 = vadd.s32 %v441_v8, %v435_v5  ;;  %v470_v26 = vsel %vm469_vm4, 1, %v1471_v7 }
  0x23   :  { %1377 = vmatpush.bf16.msra.mxu3 %v1294_v15  ;;  %277 = vmatpush.bf16.msra.mxu1 %v1294_v15  ;;  %v1542_v15 = vadd.s32 1, %v418_v10 }
  0x24   :  { %v447_v22 = vadd.s32 %v445_v16, %v443_v14 }
  0x25   :  { %v488_v23 = vshrl.u32 %v1542_v15, 16 }
  0x26   :  { %1370 = vmatpush.bf16.msra.mxu2 %v1301_v17  ;;  %201 = vmatpush.bf16.msra.mxu0 %v1301_v17  ;;  %v487_v17 = vand.u32 65535, %v1542_v15 }
  0x27   :  { %1378 = vmatpush.bf16.msra.mxu3 %v1293_v18  ;;  %278 = vmatpush.bf16.msra.mxu1 %v1293_v18  ;;  %v467_v18 = vshll.u32 %v1540_v12, 16  ;;  %v1551_v32 = vmul.u32 14564, %v488_v23  ;;  %v1320_v12 = vld [vmem:[#allocation7 + $0x18] sm:$0xff] }
  0x28   :  { %v1548_v24 = vmul.u32 58254, %v487_v17 }
  0x29   :  { %vm473_vm5 = vc.u32 %v471_v19, %v467_v18  ;;  %v496_v41 = vshll.u32 %v1551_v32, 16  ;;  %v497_v19 = vshrl.u32 %v1551_v32, 16 }
  0x2a   :  { %1371 = vmatpush.bf16.msra.mxu2 %v1300_v25  ;;  %202 = vmatpush.bf16.msra.mxu0 %v1300_v25  ;;  %v464_v25 = vmul.u32 58254, %v459_v6  ;;  %v494_v33 = vshll.u32 %v1548_v24, 16  ;;  %v495_v8 = vshrl.u32 %v1548_v24, 16 }
  0x2b   :  { %1379 = vmatpush.bf16.msra.mxu3 %v1292_v31  ;;  %279 = vmatpush.bf16.msra.mxu1 %v1292_v31  ;;  %v490_v31 = vmul.u32 14564, %v487_v17 }
  0x2d   :  { %213 = vmatmul.bf16.vlgmr.msra.gmra.mxu2 %v143_v34  ;;  %203 = vmatmul.bf16.vlgmr.msra.gmra.mxu0 %v132_v36  ;;  %vm498_vm6 = vc.u32 %v490_v31, %v494_v33 }
  0x2e   :  { %373 = vmatpush.bf16.msrb.mxu2 %v1315_v30  ;;  %290 = vmatmul.bf16.vlgmr.msra.gmra.mxu3 %v220_v35  ;;  %v472_v35 = vadd.s32 %v470_v26, %v464_v25  ;;  %v499_v50 = vsel %vm498_vm6, 1, %v1471_v7 }
  0x2f   :  { %280 = vmatmul.bf16.vlgmr.msra.gmra.mxu1 %v1520_v20  ;;  %901 = vmatpush.bf16.msrb.mxu0 %v1324_v28  ;;  %v1319_v28 = vld [vmem:[#allocation7 + $0x10] sm:$0xff] }
  0x32   :  { %374 = vmatpush.bf16.msrb.mxu2 %v1314_v37  ;;  %v474_v37 = vsel %vm473_vm5, 1, %v1471_v7 }
  0x33   :  { %902 = vmatpush.bf16.msrb.mxu0 %v1323_v39  ;;  %v1339_v39 = vld [vmem:[#allocation7 + $0xb0] sm:$0xff] }
  0x36   :  { %375 = vmatpush.bf16.msrb.mxu2 %v1313_v38  ;;  %v1559_v38 = vadd.s32 1, %v419_v29 }
  0x38   :  { %v516_v45 = vand.u32 65535, %v1559_v38  ;;  %v517_v46 = vshrl.u32 %v1559_v38, 16 }
  0x3a   :  { %376 = vmatpush.bf16.msrb.mxu2 %v1312_v40  ;;  %v1565_v51 = vmul.u32 58254, %v516_v45  ;;  %v522_v6 = vmul.u32 58254, %v517_v46 }
  0x3c   :  { %v523_v56 = vshll.u32 %v1565_v51, 16  ;;  %v524_v32 = vshrl.u32 %v1565_v51, 16 }
  0x3d   :  { %208 = vmatmul.bf16.gmra.mxu0 %v140_v43  ;;  %v466_v43 = vshrl.u32 %v462_v9, 16 }
  0x3e   :  { %377 = vmatpush.bf16.msrb.mxu2 %v1311_v42  ;;  %v500_v42 = vadd.s32 %v494_v33, %v490_v31 }
  0x3f   :  { %285 = vmatmul.bf16.gmra.mxu1 %v1291_v21  ;;  %v437_v21 = vshrl.u32 %v433_v60, 16 }
  0x40   :  { %vm502_vm7 = vc.u32 %v500_v42, %v496_v41  ;;  %v1318_v41 = vld [vmem:[#allocation7 + $0x8] sm:$0xff] }
  0x41   :  { %v448_v30 = vadd.s32 %v447_v22, %v437_v21  ;;  %v503_v0 = vsel %vm502_vm7, 1, %v1471_v7 }
  0x42   :  { %378 = vmatpush.bf16.msrb.mxu2 %v1310_v44  ;;  %v476_v44 = vadd.s32 %v474_v37, %v472_v35 }
  0x43   :  { %v449_v40 = vadd.s32 %v448_v30, %v439_v27  ;;  %v1332_v30 = vld [vmem:[#allocation7 + $0x78] sm:$0xff] }
  0x44   :  { %v477_v60 = vadd.s32 %v476_v44, %v466_v43  ;;  %824 = vmatpush.bf16.msrb.mxu3 %v1332_v30  ;;  %v1331_v44 = vld [vmem:[#allocation7 + $0x70] sm:$0xff] }
  0x45   :  { %v450_v58 = vshrl.u32 %v449_v40, 4 }
  0x46   :  { %379 = vmatpush.bf16.msrb.mxu2 %v1309_v47  ;;  %v493_v47 = vmul.u32 58254, %v488_v23  ;;  %v478_v5 = vadd.s32 %v477_v60, %v468_v59  ;;  %v1340_v23 = vld [vmem:[#allocation7 + $0xb8] sm:$0xff]  ;;  %v1330_v59 = vld [vmem:[#allocation7 + $0x68] sm:$0xff] }
  0x47   :  { %v451_v4 = vmul.u32 18, %v450_v58  ;;  %1001 = vmatpush.bf16.msrb.mxu1 %v1340_v23  ;;  %v1596_v60 = vld [vmem:[%s1669_s2] ss:$0 sm:$0xff]  ;;  %v1335_v23 = vld [vmem:[#allocation7 + $0x90] sm:$0xff] }
  0x48   :  { %v501_v61 = vadd.s32 %v499_v50, %v493_v47  ;;  %v479_v18 = vshrl.u32 %v478_v5, 4  ;;  %825 = vmatpush.bf16.msrb.mxu3 %v1331_v44 }
  0x49   :  { %v452_v17 = vsub.s32 %v1531_v57, %v451_v4  ;;  %v1329_v4 = vld [vmem:[#allocation7 + $0x60] sm:$0xff] }
  0x4a   :  { %380 = vmatpush.bf16.msrb.mxu2 %v1308_v49  ;;  %v1322_v49 = vld [vmem:[#allocation7 + $0x28] sm:$0xff]  ;;  %v505_v9 = vadd.s32 %v503_v0, %v501_v61  ;;  %v480_v31 = vmul.u32 18, %v479_v18 }
  0x4b   :  { %903 = vmatpush.bf16.msrb.mxu0 %v1322_v49  ;;  %vm571_vm11 = vcmp.ne.s32.totalorder %v452_v17, 0  ;;  %vm576_vm12 = vcmp.lt.s32.totalorder %v452_v17, 0  ;;  %v586_v43 = vadd.s32 18, %v452_v17  ;;  %1002 = vmatpush.bf16.msrb.mxu1 %v1339_v39  ;;  %v1338_v49 = vld [vmem:[#allocation7 + $0xa8] sm:$0xff] }
  0x4c   :  { %v506_v22 = vadd.s32 %v505_v9, %v495_v8  ;;  %vm581_vm14 = vmand %vm576_vm12, %vm571_vm11  ;;  %826 = vmatpush.bf16.msrb.mxu3 %v1330_v59  ;;  %vm672_vm11 = vcmask 1043456   ;;  %vm673_vm12 = vsmask.f32 7938 }
  0x4d   :  { %381 = vmatmul.bf16.vlgmr.msrb.gmra.mxu2 %v319_v52  ;;  %v519_v52 = vmul.u32 14564, %v516_v45  ;;  %v481_v45 = vsub.s32 %v1535_v1, %v480_v31  ;;  %v591_v58 = vsel %vm581_vm14, %v586_v43, %v452_v17 }
  0x4e   :  { %v507_v37 = vadd.s32 %v506_v22, %v497_v19  ;;  %vm596_vm3 = vcmp.ge.s32.totalorder %v591_v58, 1  ;;  %vm601_vm4 = vcmp.le.s32.totalorder %v591_v58, 16 }
  0x4f   :  { %vm527_vm8 = vc.u32 %v519_v52, %v523_v56  ;;  %904 = vmatpush.bf16.msrb.mxu0 %v1321_v63  ;;  %v529_v11 = vadd.s32 %v523_v56, %v519_v52  ;;  %v1317_v52 = vld [vmem:[#allocation7] sm:$0xff]  ;;  %1003 = vmatpush.bf16.msrb.mxu1 %v1338_v49  ;;  %vm572_vm15 = vcmp.ne.s32.totalorder %v481_v45, 0  ;;  %vm577_vm2 = vcmp.lt.s32.totalorder %v481_v45, 0  ;;  %vm606_vm6 = vmand %vm596_vm3, %vm601_vm4 }
  0x50   :  { %v528_v10 = vsel %vm527_vm8, 1, %v1471_v7  ;;  %vm582_vm5 = vmand %vm577_vm2, %vm572_vm15  ;;  %827 = vmatpush.bf16.msrb.mxu3 %v1329_v4  ;;  %vm621_vm4 = vsmask.f32 256 }
  0x51   :  { %v530_v21 = vadd.s32 %v528_v10, %v522_v6  ;;  %vm1610_vm15 = vmand %vm672_vm11, %vm673_vm12 }
  0x53   :  { %905 = vmatpush.bf16.msrb.mxu0 %v1320_v12 }
  0x57   :  { %906 = vmatpush.bf16.msrb.mxu0 %v1319_v28  ;;  %v1327_v28 = vld [vmem:[#allocation7 + $0x50] sm:$0xff] }
  0x5b   :  { %907 = vmatpush.bf16.msrb.mxu0 %v1318_v41 }
  0x5d   :  { %386 = vmatmul.bf16.gmra.mxu2 %v321_v54  ;;  %v1569_v54 = vadd.s32 1, %v420_v48  ;;  %v508_v48 = vshrl.u32 %v507_v37, 4  ;;  %v675_v37 = vld [vmem:[#allocation2] sm:$0xf] }
  0x5f   :  { %v545_v3 = vand.u32 65535, %v1569_v54  ;;  %v546_v13 = vshrl.u32 %v1569_v54, 16  ;;  %908 = vmatpush.bf16.msrb.mxu0 %v1317_v52  ;;  %v1325_v52 = vld [vmem:[#allocation7 + $0x40] sm:$0xff] }
  0x61   :  { %v548_v14 = vmul.u32 14564, %v545_v3  ;;  %v1579_v16 = vmul.u32 58254, %v545_v3  ;;  %v1584_v25 = vmul.u32 14564, %v546_v13  ;;  %v551_v40 = vmul.u32 58254, %v546_v13 }
  0x62   :  { %v587_v3 = vadd.s32 18, %v481_v45 }
  0x63   :  { %v552_v26 = vshll.u32 %v1579_v16, 16  ;;  %v554_v57 = vshll.u32 %v1584_v25, 16  ;;  %v553_v63 = vshrl.u32 %v1579_v16, 16  ;;  %v555_v9 = vshrl.u32 %v1584_v25, 16 }
  0x64   :  { %v592_v13 = vsel %vm582_vm5, %v587_v3, %v481_v45 }
  0x65   :  { %vm556_vm10 = vc.u32 %v548_v14, %v552_v26  ;;  %v558_v35 = vadd.s32 %v552_v26, %v548_v14  ;;  %v1328_v14 = vld [vmem:[#allocation7 + $0x58] sm:$0xff] }
  0x66   :  { %v557_v42 = vsel %vm556_vm10, 1, %v1471_v7  ;;  %828 = vmatpush.bf16.msrb.mxu3 %v1328_v14  ;;  %vm602_vm10 = vcmp.le.s32.totalorder %v592_v13, 16 }
  0x67   :  { %vm560_vm13 = vc.u32 %v558_v35, %v554_v57  ;;  %v559_v50 = vadd.s32 %v557_v42, %v551_v40 }
  0x6a   :  { %829 = vmatpush.bf16.msrb.mxu3 %v1327_v28 }
  0x6d   :  { %391 = vmatmul.bf16.gmra.mxu2 %v320_v53  ;;  %v1567_v53 = vmul.u32 14564, %v517_v46 }
  0x6f   :  { %v525_v2 = vshll.u32 %v1567_v53, 16  ;;  %v526_v46 = vshrl.u32 %v1567_v53, 16 }
  0x71   :  { %vm531_vm9 = vc.u32 %v529_v11, %v525_v2  ;;  %v1336_v11 = vld [vmem:[#allocation7 + $0x98] sm:$0xff] }
  0x72   :  { %v532_v24 = vsel %vm531_vm9, 1, %v1471_v7  ;;  %vm597_vm9 = vcmp.ge.s32.totalorder %v592_v13, 1 }
  0x73   :  { %v534_v33 = vadd.s32 %v532_v24, %v530_v21  ;;  %vm607_vm14 = vmand %vm597_vm9, %vm602_vm10 }
  0x75   :  { %v535_v47 = vadd.s32 %v534_v33, %v524_v32  ;;  %v1334_v33 = vld [vmem:[#allocation7 + $0x88] sm:$0xff] }
  0x77   :  { %v536_v53 = vadd.s32 %v535_v47, %v526_v46 }
  0x79   :  { %v537_v6 = vshrl.u32 %v536_v53, 4 }
  0x7b   :  { %v538_v18 = vmul.u32 18, %v537_v6 }
  0x7d   :  { %v539_v30 = vsub.s32 %v1559_v38, %v538_v18  ;;  %v1326_v38 = vld [vmem:[#allocation7 + $0x48] sm:$0xff] }
  0x7e   :  { %830 = vmatpush.bf16.msrb.mxu3 %v1326_v38 }
  0x7f   :  { %vm574_vm2 = vcmp.ne.s32.totalorder %v539_v30, 0  ;;  %vm579_vm3 = vcmp.lt.s32.totalorder %v539_v30, 0 }
  0x80   :  { %vm584_vm9 = vmand %vm579_vm3, %vm574_vm2 }
  0x82   :  { %831 = vmatpush.bf16.msrb.mxu3 %v1325_v52 }
  0xaa   :  { %v204_v27 = vpop.f32.mrf.mxu0 }
  0xac   :  { %v281_v29 = vpop.f32.mrf.mxu1 }
  0xad   :  { %v282_v51 = vadd.f32 %v281_v29, %v204_v27 }
  0xb0   :  { %v1554_v34 = vpop.f32.mrf.mxu2 }
  0xb1   :  { %v1556_v36 = vpop.f32.mrf.mxu3 }
  0xb2   :  { %v206_v1 = vpop.f32.mrf.mxu0 }
  0xb4   :  { %v283_v56 = vpop.f32.mrf.mxu1 }
  0xb5   :  { %v284_v17 = vadd.f32 %v283_v56, %v206_v1 }
  0xb8   :  { %v216_v55 = vpop.f32.mrf.mxu2 }
  0xb9   :  { %v293_v62 = vpop.f32.mrf.mxu3  ;;  %v561_v55 = vsel %vm560_vm13, 1, %v1471_v7  ;;  %v1337_v7 = vld [vmem:[#allocation7 + $0xa0] sm:$0xff] }
  0xba   :  { %v509_v62 = vmul.u32 18, %v508_v48  ;;  %v563_v0 = vadd.s32 %v561_v55, %v559_v50  ;;  %1004 = vmatpush.bf16.msrb.mxu1 %v1337_v7  ;;  %v209_v25 = vpop.f32.mrf.mxu0  ;;  %v1333_v48 = vld [vmem:[#allocation7 + $0x80] sm:$0xff] }
  0xbc   :  { %v510_v8 = vsub.s32 %v1542_v15, %v509_v62  ;;  %v564_v10 = vadd.s32 %v563_v0, %v553_v63  ;;  %v286_v26 = vpop.f32.mrf.mxu1 }
  0xbd   :  { %v287_v40 = vadd.f32 %v286_v26, %v209_v25 }
  0xbe   :  { %1005 = vmatpush.bf16.msrb.mxu1 %v1336_v11  ;;  %vm573_vm7 = vcmp.ne.s32.totalorder %v510_v8, 0  ;;  %vm578_vm8 = vcmp.lt.s32.totalorder %v510_v8, 0  ;;  %v565_v22 = vadd.s32 %v564_v10, %v555_v9  ;;  %v588_v27 = vadd.s32 18, %v510_v8 }
  0xbf   :  { %vm583_vm13 = vmand %vm578_vm8, %vm573_vm7  ;;  %vm622_vm7 = vsmask.f32 4368  ;;  %vm687_vm8 = vcmask 1040384  }
  0xc0   :  { %v566_v32 = vshrl.u32 %v565_v22, 4  ;;  %v593_v42 = vsel %vm583_vm13, %v588_v27, %v510_v8  ;;  %vm1622_vm11 = vmor %vm621_vm4, %vm622_vm7 }
  0xc1   :  { %vm598_vm5 = vcmp.ge.s32.totalorder %v593_v42, 1  ;;  %vm688_vm12 = vmand %vm687_vm8, %vm621_vm4  ;;  %vm681_vm8 = vcmask 1041408  }
  0xc2   :  { %1006 = vmatpush.bf16.msrb.mxu1 %v1335_v23  ;;  %v567_v47 = vmul.u32 18, %v566_v32  ;;  %v211_v1 = vpop.f32.mrf.mxu0 }
  0xc4   :  { %v288_v53 = vpop.f32.mrf.mxu1 }
  0xc5   :  { %v289_v3 = vadd.f32 %v288_v53, %v211_v1 }
  0xc6   :  { %1007 = vmatpush.bf16.msrb.mxu1 %v1334_v33 }
  0xca   :  { %1008 = vmatpush.bf16.msrb.mxu1 %v1333_v48 }
  0xd0   :  { %v382_v61 = vpop.f32.mrf.mxu2 }
  0xd1   :  { %v396_v2 = vadd.f32 %v382_v61, %v282_v51  ;;  %v589_v51 = vadd.s32 18, %v539_v30  ;;  %v568_v61 = vsub.s32 %v1569_v54, %v567_v47 }
  0xd3   :  { %v405_v5 = vadd.f32 %v1596_v60, %v396_v2  ;;  %v594_v7 = vsel %vm584_vm9, %v589_v51, %v539_v30  ;;  %vm575_vm13 = vcmp.ne.s32.totalorder %v568_v61, 0  ;;  %v590_v11 = vadd.s32 18, %v568_v61 }
  0xd4   :  { %vm604_vm2 = vcmp.le.s32.totalorder %v594_v7, 16  ;;  %vm682_vm9 = vsmask.f32 1280 }
  0xd5   :  { %v410_v12 = vmax.f32 %v405_v5, 0.0 }
  0xd7   :  { %v611_v16 = vsel %vm606_vm6, %v410_v12, 0.0  ;;  %vm603_vm6 = vcmp.le.s32.totalorder %v593_v42, 16 }
  0xd8   :  { %v616_v19 = vpack.c.bf16 %v611_v16, %v611_v16  ;;  %v384_v21 = vpop.f32.mrf.mxu2  ;;  %vm608_vm10 = vmand %vm598_vm5, %vm603_vm6 }
  0xd9   :  { %v397_v15 = vadd.f32 %v384_v21, %v284_v17  ;;  %v292_v21 = vadd.f32 %v1556_v36, %v1554_v34 }
  0xda   :  { %v625_v24 = vshrl.u32 %v616_v19, 16  ;;  %v628_v31 = vshll.u32 %v616_v19, 16 }
  0xdb   :  { %v406_v29 = vadd.f32 %v1596_v60, %v397_v15 }
  0xdc   :  { %v627_v57 = vrot.slane %v625_v24, 7 }
  0xdd   :  { %v411_v39 = vmax.f32 %v406_v29, 0.0 }
  0xde   :  { %v630_v41 = vor.u32 %v628_v31, %v627_v57  ;;  %v631_v63 = vrot.slane %v627_v57, 4 }
  0xdf   :  { %v612_v43 = vsel %vm607_vm14, %v411_v39, 0.0  ;;  %vm580_vm14 = vcmp.lt.s32.totalorder %v568_v61, 0 }
  0xe0   :  { %v676_v44 = vsel %vm1610_vm15, %v630_v41, %v675_v37  ;;  %v617_v45 = vpack.c.bf16 %v612_v43, %v612_v43  ;;  %v387_v46 = vpop.f32.mrf.mxu2  ;;  %vm599_vm15 = vcmp.ge.s32.totalorder %v594_v7, 1  ;;  %vm585_vm3 = vmand %vm580_vm14, %vm575_vm13  ;;  %vm693_vm13 = vsmask.f32 7942 }
  0xe1   :  { %677 = vst [vmem:[#allocation2] sm:$0xf] %v676_v44  ;;  %v398_v49 = vadd.f32 %v387_v46, %v287_v40  ;;  %vm609_vm4 = vmand %vm599_vm15, %vm604_vm2  ;;  %v595_v19 = vsel %vm585_vm3, %v590_v11, %v568_v61  ;;  %v684_v44 = vld [vmem:[#allocation2 + $0x10] sm:$0x3] }
  0xe2   :  { %v633_v50 = vshrl.u32 %v617_v45, 16  ;;  %v636_v59 = vshll.u32 %v617_v45, 16  ;;  %vm600_vm5 = vcmp.ge.s32.totalorder %v595_v19, 1  ;;  %vm605_vm6 = vcmp.le.s32.totalorder %v595_v19, 16 }
  0xe3   :  { %v407_v55 = vadd.f32 %v1596_v60, %v398_v49  ;;  %vm610_vm7 = vmand %vm600_vm5, %vm605_vm6  ;;  %v1352_v19 = vunpack.c.h.bf16 %v1520_v20 }
  0xe4   :  { %v635_v58 = vrot.slane %v633_v50, 7 }
  0xe5   :  { %v412_v62 = vmax.f32 %v407_v55, 0.0 }
  0xe6   :  { %v638_v0 = vor.u32 %v636_v59, %v635_v58  ;;  %v640_v17 = vrot.slane %v635_v58, 4 }
  0xe7   :  { %v613_v2 = vsel %vm608_vm10, %v412_v62, 0.0  ;;  %vm683_vm10 = vmand %vm681_vm8, %vm682_vm9 }
  0xe8   :  { %v639_v4 = vsel %vm1622_vm11, %v631_v63, %v638_v0  ;;  %v689_v5 = vld [vmem:[#allocation2] sm:$0x1]  ;;  %v618_v54 = vpack.c.bf16 %v613_v2, %v613_v2  ;;  %v389_v6 = vpop.f32.mrf.mxu2  ;;  %v1361_v42 = vld [vmem:[#allocation2] sm:$0xe] }
  0xe9   :  { %678 = vst [vmem:[#allocation2 + $0x4] sm:$0xf] %v639_v4  ;;  %v690_v8 = vsel %vm688_vm12, 0, %v689_v5  ;;  %v399_v9 = vadd.f32 %v389_v6, %v289_v3  ;;  %vm692_vm12 = vcmask 1041409  }
  0xea   :  { %691 = vst [vmem:[#allocation2] sm:$0x1] %v690_v8  ;;  %v642_v10 = vshrl.u32 %v618_v54, 16  ;;  %v645_v14 = vshll.u32 %v618_v54, 16  ;;  %vm694_vm14 = vmand %vm692_vm12, %vm693_vm13 }
  0xeb   :  { %v408_v12 = vadd.f32 %v1596_v60, %v399_v9 }
  0xec   :  { %v644_v13 = vrot.slane %v642_v10, 7 }
  0xed   :  { %v413_v16 = vmax.f32 %v408_v12, 0.0 }
  0xee   :  { %v647_v18 = vor.u32 %v645_v14, %v644_v13  ;;  %v649_v34 = vrot.slane %v644_v13, 4 }
  0xef   :  { %v614_v22 = vsel %vm609_vm4, %v413_v16, 0.0 }
  0xf0   :  { %v648_v23 = vsel %vm1622_vm11, %v640_v17, %v647_v18  ;;  %v619_v15 = vpack.c.bf16 %v614_v22, %v614_v22  ;;  %v392_v24 = vpop.f32.mrf.mxu2  ;;  %v1360_v39 = vld [vmem:[#allocation2] sm:$0xf0]  ;;  %v1351_v18 = vunpack.c.l.bf16 %v1520_v20 }
  0xf1   :  { %679 = vst [vmem:[#allocation2 + $0x8] sm:$0xf] %v648_v23  ;;  %v400_v25 = vadd.f32 %v392_v24, %v292_v21  ;;  %v1346_v26 = vld [vmem:[#allocation2] sm:$0xff]   ;;  %v1362_v45 = vor.u32 %v1361_v42, %v1360_v39 }
  0xf2   :  { %v651_v27 = vshrl.u32 %v619_v15, 16  ;;  %909 = vmatmul.bf16.vlgmr.msrb.gmra.mxu0 %v1346_v26  ;;  %v654_v30 = vshll.u32 %v619_v15, 16  ;;  %v751_v50 = vshrl.u32 %v1346_v26, 16  ;;  %v1054_v23 = vrot.slane %v1351_v18, 1 }
  0xf3   :  { %v409_v28 = vadd.f32 %v1596_v60, %v400_v25  ;;  %v753_v60 = vshll.u32 %v1346_v26, 16  ;;  %v945_v51 = vrot.slane %v1362_v45, 1  ;;  %v1055_v15 = vrot.slane %v1352_v19, 1  ;;  %v1388_v25 = vld [vmem:[%s1671_s4] ss:$0 sm:$0xff] }
  0xf4   :  { %v653_v29 = vrot.slane %v651_v27, 7  ;;  %v1363_v26 = vld [vmem:[#allocation3 + $0x8] sm:$0xff]  }
  0xf5   :  { %v414_v57 = vmax.f32 %v409_v28, 0.0  ;;  %v755_v47 = vrot.slane %v753_v60, 1  ;;  %v1056_v28 = vsel %vm316_vm1, %v1054_v23, %v1055_v15 }
  0xf6   :  { %v656_v36 = vor.u32 %v654_v30, %v653_v29  ;;  %v658_v38 = vrot.slane %v653_v29, 4  ;;  %v1355_v29 = vunpack.c.l.bf16 %v1363_v26 }
  0xf7   :  { %v615_v31 = vsel %vm610_vm7, %v414_v57, 0.0  ;;  %v756_v58 = vor.u32 %v755_v47, %v751_v50  ;;  %v1042_v47 = vld [vmem:[#allocation3 + $0x10] sm:$0x3] }
  0xf8   :  { %v657_v32 = vsel %vm1622_vm11, %v649_v34, %v656_v36  ;;  %v620_v33 = vpack.c.bf16 %v615_v31, %v615_v31  ;;  %v394_v35 = vpop.f32.mrf.mxu2  ;;  %v1057_v20 = vrot.slane %v1355_v29, 1  ;;  %v1047_v50 = vunpack.c.l.bf16 %v1042_v47 }
  0xf9   :  { %680 = vst [vmem:[#allocation2 + $0xc] sm:$0xf] %v657_v32 }
  0xfa   :  { %v660_v37 = vshrl.u32 %v620_v33, 16  ;;  %v663_v41 = vshll.u32 %v620_v33, 16 }
  0xfc   :  { %v662_v40 = vrot.slane %v660_v37, 7  ;;  %v1058_v37 = vsel %vm316_vm1, %v1055_v15, %v1057_v20 }
  0xfe   :  { %v665_v43 = vor.u32 %v663_v41, %v662_v40 }
 0x100   :  { %v666_v46 = vsel %vm1622_vm11, %v658_v38, %v665_v43  ;;  %v1316_v48 = vld [vmem:[#allocation2 + $0x8] sm:$0xff]  ;;  %v1356_v38 = vunpack.c.h.bf16 %v1363_v26 }
 0x101   :  { %v685_v49 = vsel %vm683_vm10, %v666_v46, %v684_v44  ;;  %v946_v52 = vrot.slane %v1316_v48, 1  ;;  %v758_v55 = vshll.u32 %v1316_v48, 16  ;;  %v762_v5 = vshrl.u32 %v1316_v48, 16 }
 0x102   :  { %686 = vst [vmem:[#allocation2 + $0x10] sm:$0x3] %v685_v49  ;;  %914 = vmatmul.bf16.gmra.mxu0 %v1316_v48  ;;  %v1059_v44 = vrot.slane %v1356_v38, 1 }
 0x103   :  { %v947_v59 = vsel %vm316_vm1, %v945_v51, %v946_v52  ;;  %v760_v1 = vrot.slane %v758_v55, 1 }
 0x104   :  { %1009 = vmatmul.bf16.vlgmr.msrb.gmra.mxu1 %v947_v59  ;;  %v1060_v49 = vsel %vm316_vm1, %v1057_v20, %v1059_v44 }
 0x105   :  { %v761_v53 = vsel %vm120_vm0, %v756_v58, %v760_v1  ;;  %v764_v8 = vor.u32 %v762_v5, %v760_v1  ;;  %v1061_v58 = vrot.slane %v1047_v50, 1 }
 0x106   :  { %832 = vmatmul.bf16.vlgmr.msrb.gmra.mxu3 %v761_v53 }
 0x109   :  { %v695_v61 = vld [vmem:[#allocation2 + $0x10] sm:$0x2]  ;;  %v702_v56 = vld [vmem:[#allocation2 + $0x10] sm:$0x1] }
 0x10a   :  { %v696_v62 = vsel %vm694_vm14, 0, %v695_v61  ;;  %v848_v63 = vunpack.c.l.b16 %v702_v56  ;;  %v1062_v56 = vsel %vm316_vm1, %v1059_v44, %v1061_v58 }
 0x10b   :  { %697 = vst [vmem:[#allocation2 + $0x10] sm:$0x2] %v696_v62 }
 0x10c   :  { %v849_v0 = vpack.c.b16 %v848_v63, %v848_v63 }
 0x112   :  { %919 = vmatmul.bf16.gmra.mxu0 %v849_v0  ;;  %v719_v7 = vld [vmem:[#allocation2 + $0x10] sm:$0x3] }
 0x113   :  { %v746_v2 = vunpack.c.l.b16 %v719_v7 }
 0x115   :  { %v749_v3 = vpack.c.b16 %v746_v2, %v746_v2 }
 0x117   :  { %v948_v4 = vrot.slane %v749_v3, 1  ;;  %v766_v54 = vshll.u32 %v749_v3, 16  ;;  %v770_v11 = vshrl.u32 %v749_v3, 16 }
 0x119   :  { %v949_v6 = vsel %vm316_vm1, %v946_v52, %v948_v4  ;;  %v768_v9 = vrot.slane %v766_v54, 1 }
 0x11a   :  { %1014 = vmatmul.bf16.gmra.mxu1 %v949_v6 }
 0x11b   :  { %v769_v10 = vsel %vm120_vm0, %v764_v8, %v768_v9  ;;  %v772_v12 = vor.u32 %v770_v11, %v768_v9 }
 0x11c   :  { %837 = vmatmul.bf16.gmra.mxu3 %v769_v10 }
 0x12a   :  { %1019 = vmatmul.bf16.gmra.mxu1 %v948_v4 }
 0x12c   :  { %842 = vmatmul.bf16.gmra.mxu3 %v772_v12 }
 0x16f   :  { %v910_v13 = vpop.f32.mrf.mxu0 }
 0x177   :  { %v912_v14 = vpop.f32.mrf.mxu0 }
 0x17f   :  { %v915_v16 = vpop.f32.mrf.mxu0 }
 0x181   :  { %v1010_v17 = vpop.f32.mrf.mxu1 }
 0x187   :  { %v917_v21 = vpop.f32.mrf.mxu0 }
 0x189   :  { %v833_v22 = vpop.f32.mrf.mxu3  ;;  %v1012_v57 = vpop.f32.mrf.mxu1 }
 0x18a   :  { %v911_v24 = vadd.f32 %v910_v13, %v833_v22 }
 0x18c   :  { %v1024_v27 = vadd.f32 %v1010_v17, %v911_v24 }
 0x18e   :  { %v1033_v30 = vadd.f32 %v1388_v25, %v1024_v27 }
 0x18f   :  { %v920_v34 = vpop.f32.mrf.mxu0 }
 0x190   :  { %v1068_v36 = vadd.f32 %v1056_v28, %v1033_v30 }
 0x191   :  { %v835_v31 = vpop.f32.mrf.mxu3 }
 0x192   :  { %v1073_v32 = vmax.f32 %v1068_v36, 0.0  ;;  %v913_v33 = vadd.f32 %v912_v14, %v835_v31 }
 0x194   :  { %1078 = vst [vmem:[%s1672_s5 + $0x1] sm:$0xff] %v1073_v32  ;;  %v1025_v35 = vadd.f32 %v1012_v57, %v913_v33 }
 0x196   :  { %v1034_v39 = vadd.f32 %v1388_v25, %v1025_v35 }
 0x197   :  { %v1015_v40 = vpop.f32.mrf.mxu1  ;;  %v922_v41 = vpop.f32.mrf.mxu0 }
 0x198   :  { %v1069_v60 = vadd.f32 %v1058_v37, %v1034_v39 }
 0x19a   :  { %v1074_v42 = vmax.f32 %v1069_v60, 0.0 }
 0x19c   :  { %1079 = vst [vmem:[%s1672_s5 + $0x9] sm:$0xff] %v1074_v42 }
 0x19f   :  { %v838_v43 = vpop.f32.mrf.mxu3  ;;  %v1017_v45 = vpop.f32.mrf.mxu1 }
 0x1a0   :  { %v916_v46 = vadd.f32 %v915_v16, %v838_v43 }
 0x1a2   :  { %v1026_v48 = vadd.f32 %v1015_v40, %v916_v46 }
 0x1a4   :  { %v1035_v51 = vadd.f32 %v1388_v25, %v1026_v48 }
 0x1a6   :  { %v1070_v52 = vadd.f32 %v1060_v49, %v1035_v51 }
 0x1a7   :  { %v840_v55 = vpop.f32.mrf.mxu3  ;;  %v1020_v59 = vpop.f32.mrf.mxu1 }
 0x1a8   :  { %v1075_v1 = vmax.f32 %v1070_v52, 0.0  ;;  %v918_v53 = vadd.f32 %v917_v21, %v840_v55 }
 0x1aa   :  { %1080 = vst [vmem:[%s1672_s5 + $0x11] sm:$0xff] %v1075_v1  ;;  %v1027_v61 = vadd.f32 %v1017_v45, %v918_v53 }
 0x1ac   :  { %v1036_v62 = vadd.f32 %v1388_v25, %v1027_v61 }
 0x1ae   :  { %v1071_v63 = vadd.f32 %v1062_v56, %v1036_v62 }
 0x1af   :  { %v843_v0 = vpop.f32.mrf.mxu3  ;;  %v1022_v7 = vpop.f32.mrf.mxu1 }
 0x1b0   :  { %v1076_v2 = vmax.f32 %v1071_v63, 0.0  ;;  %v921_v3 = vadd.f32 %v920_v34, %v843_v0 }
 0x1b2   :  { %1081 = vst [vmem:[%s1672_s5 + $0x19] sm:$0xff] %v1076_v2  ;;  %v1028_v4 = vadd.f32 %v1020_v59, %v921_v3 }
 0x1b4   :  { %v1037_v5 = vadd.f32 %v1388_v25, %v1028_v4 }
 0x1b6   :  { %v1072_v54 = vadd.f32 %v1061_v58, %v1037_v5 }
 0x1b7   :  { %v845_v6 = vpop.f32.mrf.mxu3 }
 0x1b8   :  { %v1077_v8 = vmax.f32 %v1072_v54, 0.0 }
 0x1ba   :  { %1082 = vst [vmem:[%s1672_s5 + $0x21] sm:$0x3] %v1077_v8 }
 0x1bb   :  { %1089 = vsyncpa [#allocation4], 1 }
 0x1bc   :  { %1090 = vsyncpa [#allocation6], 1 }

</bundles_post_ra>
